<compile_context>
chip_gen: v7x
topology: tpu7x:2x2x1
jax: 0.10.0
libtpu: 0.0.40
codegen_flags: <defaults>
</compile_context>

<pallas_src>
import jax
import jax.numpy as jnp
import numpy as np
from jax.experimental import pallas as pl
from jax.experimental.pallas import tpu as pltpu


# ----------------------------- Pallas kernel ------------------------------ #
def rnn_attention_kernel(h_ref, eo_ref, w_ref, bv_ref, a_ref):
    h = h_ref[...]                       # (Bp, H)
    eo_flat = eo_ref[...]                # (Bp*S, 2H)
    Bp, H = h.shape
    S = eo_flat.shape[0] // Bp

    w_h = w_ref[:H, :]                   # (H, H)   static slices of the stacked weight
    w_eo = w_ref[H:, :]                  # (2H, H)
    bv = bv_ref[...]                     # (2, H)
    b = bv[0:1, :]                       # (1, H)   attn bias
    v = bv[1:2, :]                       # (1, H)   v weight row

    # energies: tanh(W_h h + b + W_eo eo); bias folded before the (Bp,S,H) broadcast.
    h_proj = jnp.dot(h, w_h, preferred_element_type=jnp.float32) + b          # (Bp, H)
    eo_proj = jnp.dot(eo_flat, w_eo, preferred_element_type=jnp.float32)      # (Bp*S, H)
    en = jnp.tanh(eo_proj.reshape(Bp, S, H) + h_proj[:, None, :])             # (Bp, S, H)

    # scores = en . v, then numerically-stable softmax over the encoder axis S.
    scores = jnp.sum(en * v[None, :, :], axis=-1)                             # (Bp, S)
    scores = scores - jnp.max(scores, axis=1, keepdims=True)
    e = jnp.exp(scores)
    a_ref[...] = e / jnp.sum(e, axis=1, keepdims=True)


# ------------------------------ wrapper ----------------------------------- #
def rnn_attention_forward(kp, h, eo):
    """kp: packed kernel params; h: (h, c) tuple or (L, B, H) array; eo: (B, S, 2H)."""
    # glue equivalent to the PyTorch preprocessing in RNNAttention.forward
    if isinstance(h, tuple):
        h = h[0]
    if h.ndim == 3 and h.shape[0] > 1:
        h = h[-1][None]
    B, S, twoH = eo.shape
    H = twoH // 2
    h2 = h.reshape(B, H).astype(jnp.float32)

    Bp = pl.cdiv(B, 8) * 8                              # pad batch to full sublanes
    pad = Bp - B
    h_p = jnp.pad(h2, ((0, pad), (0, 0)))
    eo_p = jnp.pad(eo.astype(jnp.float32), ((0, pad), (0, 0), (0, 0)))
    eo_flat = eo_p.reshape(Bp * S, twoH)                # flatten wrapper-side (free in XLA)

    vmem = pl.BlockSpec(memory_space=pltpu.MemorySpace.VMEM)
    a = pl.pallas_call(
        rnn_attention_kernel,
        out_shape=jax.ShapeDtypeStruct((Bp, S), jnp.float32),
        in_specs=[vmem, vmem, vmem, vmem],
        out_specs=vmem,
    )(h_p, eo_flat, kp['attn_w'], kp['bv'])
    return a[:B]


# --------------------- pure-JAX reference (PyTorch math) ------------------- #
def reference_forward(w, h, eo):
    if isinstance(h, tuple):
        h = h[0]
    if h.ndim == 3 and h.shape[0] > 1:
        h = h[-1][None]
    sl = eo.shape[1]
    hp = jnp.transpose(h, (1, 0, 2))                    # permute(1, 0, 2) -> (B, 1, H)
    hp = jnp.tile(hp, (1, sl, 1))                       # repeat(1, sl, 1) -> (B, S, H)
    ei = jnp.concatenate([hp, eo], axis=2)              # (B, S, 3H)
    en = jnp.tanh(ei @ w['attn_W'].T + w['attn_b'])
    a = jnp.squeeze(en @ w['v_W'].T, axis=2)            # (B, S)
    return jax.nn.softmax(a, axis=1)


# --------------------------------- main ------------------------------------ #
if __name__ == "__main__":
    H, B, S = 32, 2, 8                                  # hidden_dim, batch, encoder seq-len
    key = jax.random.PRNGKey(0)
    ks = jax.random.split(key, 6)

    # PyTorch-shaped parameters of RNNAttention(hidden_dim=H)
    w = {
        'attn_W': 0.1 * jax.random.normal(ks[0], (H, 3 * H), jnp.float32),  # Linear(3H,H).weight
        'attn_b': 0.1 * jax.random.normal(ks[1], (H,), jnp.float32),        # Linear(3H,H).bias
        'v_W':    0.1 * jax.random.normal(ks[2], (1, H), jnp.float32),      # Linear(H,1).weight
    }

    # kernel-layout params: transposed/stacked so the kernel needs only 2 weight DMAs
    kp = {
        'attn_w': w['attn_W'].T,                                    # (3H, H): [W_h ; W_eo]
        'bv':     jnp.stack([w['attn_b'], w['v_W'][0]], axis=0),    # (2, H):  [bias ; v]
    }

    h0 = 0.5 * jax.random.normal(ks[3], (1, B, H), jnp.float32)
    c0 = 0.5 * jax.random.normal(ks[4], (1, B, H), jnp.float32)
    eo = jax.random.normal(ks[5], (B, S, 2 * H), jnp.float32)
    hidden = (h0, c0)                                   # exercise the tuple-input path

    a = rnn_attention_forward(kp, hidden, eo)
    jax.block_until_ready(a)

    a_ref = reference_forward(w, hidden, eo)
    assert a.shape == (B, S)
    assert np.allclose(np.asarray(a), np.asarray(a_ref), atol=1e-5), "attention mismatch"
    assert np.allclose(np.asarray(jnp.sum(a, axis=1)), 1.0, atol=1e-5), "softmax not normalized"

    print("KERNEL_OK")
</pallas_src>

<mosaic_0001>
module attributes {stable_mosaic.version = 11 : i64} {
  func.func @rnn_attention_kernel(%arg0: memref<8x32xf32, #tpu.memory_space<vmem>>, %arg1: memref<64x64xf32, #tpu.memory_space<vmem>>, %arg2: memref<96x32xf32, #tpu.memory_space<vmem>>, %arg3: memref<2x32xf32, #tpu.memory_space<vmem>>, %arg4: memref<8x8xf32, #tpu.memory_space<vmem>>) attributes {dimension_semantics = [], scalar_prefetch = 0 : i64, scratch_operands = 0 : i64, tpu.core_type = #tpu.core_type<tc>} {
    %c0 = arith.constant 0 : index
    %c0_0 = arith.constant 0 : index
    %0 = vector.load %arg0[%c0, %c0_0] : memref<8x32xf32, #tpu.memory_space<vmem>>, vector<8x32xf32>
    %c0_1 = arith.constant 0 : index
    %c0_2 = arith.constant 0 : index
    %1 = vector.load %arg1[%c0_1, %c0_2] : memref<64x64xf32, #tpu.memory_space<vmem>>, vector<64x64xf32>
    %c0_3 = arith.constant 0 : index
    %c0_4 = arith.constant 0 : index
    %2 = vector.load %arg2[%c0_3, %c0_4] : memref<96x32xf32, #tpu.memory_space<vmem>>, vector<32x32xf32>
    %c32 = arith.constant 32 : index
    %c0_5 = arith.constant 0 : index
    %3 = vector.load %arg2[%c32, %c0_5] : memref<96x32xf32, #tpu.memory_space<vmem>>, vector<64x32xf32>
    %c0_6 = arith.constant 0 : index
    %c0_7 = arith.constant 0 : index
    %4 = vector.load %arg3[%c0_6, %c0_7] : memref<2x32xf32, #tpu.memory_space<vmem>>, vector<2x32xf32>
    %5 = vector.extract_strided_slice %4 {offsets = [0, 0], sizes = [1, 32], strides = [1, 1]} : vector<2x32xf32> to vector<1x32xf32>
    %6 = vector.extract_strided_slice %4 {offsets = [1, 0], sizes = [1, 32], strides = [1, 1]} : vector<2x32xf32> to vector<1x32xf32>
    %cst = arith.constant dense<0.000000e+00> : vector<8x32xf32>
    %7 = tpu.matmul %0, %2, %cst {dimension_numbers = #tpu.dot_dimension_numbers<[1], [0], [0], [1], [0, 0, 1, 1], [], []>} : vector<8x32xf32>, vector<32x32xf32>, vector<8x32xf32> -> vector<8x32xf32>
    %8 = vector.broadcast %5 : vector<1x32xf32> to vector<8x32xf32>
    %9 = arith.addf %7, %8 : vector<8x32xf32>
    %cst_8 = arith.constant dense<0.000000e+00> : vector<64x32xf32>
    %10 = tpu.matmul %1, %3, %cst_8 {dimension_numbers = #tpu.dot_dimension_numbers<[1], [0], [0], [1], [0, 0, 1, 1], [], []>} : vector<64x64xf32>, vector<64x32xf32>, vector<64x32xf32> -> vector<64x32xf32>
    %11 = vector.shape_cast %10 : vector<64x32xf32> to vector<8x8x32xf32>
    %12 = vector.shape_cast %9 : vector<8x32xf32> to vector<8x1x32xf32>
    %13 = vector.broadcast %12 : vector<8x1x32xf32> to vector<8x8x32xf32>
    %14 = arith.addf %11, %13 : vector<8x8x32xf32>
    %15 = math.tanh %14 : vector<8x8x32xf32>
    %16 = vector.shape_cast %6 : vector<1x32xf32> to vector<1x1x32xf32>
    %17 = vector.broadcast %16 : vector<1x1x32xf32> to vector<8x8x32xf32>
    %18 = arith.mulf %15, %17 : vector<8x8x32xf32>
    %cst_9 = arith.constant dense<0.000000e+00> : vector<8x8xf32>
    %19 = vector.multi_reduction <add>, %18, %cst_9 [2] : vector<8x8x32xf32> to vector<8x8xf32>
    %cst_10 = arith.constant dense<0xFF800000> : vector<8xf32>
    %20 = vector.multi_reduction <maximumf>, %19, %cst_10 [1] : vector<8x8xf32> to vector<8xf32>
    %21 = vector.shape_cast %20 : vector<8xf32> to vector<8x1xf32>
    %22 = vector.broadcast %21 : vector<8x1xf32> to vector<8x8xf32>
    %23 = arith.subf %19, %22 : vector<8x8xf32>
    %24 = math.exp %23 : vector<8x8xf32>
    %cst_11 = arith.constant dense<0.000000e+00> : vector<8xf32>
    %25 = vector.multi_reduction <add>, %24, %cst_11 [1] : vector<8x8xf32> to vector<8xf32>
    %26 = vector.shape_cast %25 : vector<8xf32> to vector<8x1xf32>
    %27 = vector.broadcast %26 : vector<8x1xf32> to vector<8x8xf32>
    %28 = arith.divf %24, %27 : vector<8x8xf32>
    %c0_12 = arith.constant 0 : index
    %c0_13 = arith.constant 0 : index
    %29 = vector.load %arg4[%c0_12, %c0_13] : memref<8x8xf32, #tpu.memory_space<vmem>>, vector<8x8xf32>
    tpu.vector_store %arg4[%c0_12, %c0_13], %28 {strides = array<i32>} : memref<8x8xf32, #tpu.memory_space<vmem>>, vector<8x8xf32>,
    return
  }
}

</mosaic_0001>

<bundles_post_ra>
// kernel: tpu_custom_call.1
= control target key start
LH: loop header
LB: loop body
LE: loop exit
PB: predicated region body
PF: predicated region fallthrough
CT: control target
= control target key end

     0   :  { %v914_v3 = vmov 0.0|0.0   ;;  %vm915_vm0 = vmmov 0   ;;  %v916_v8 = vmov 0.0   ;;  %vm118_vm1 = vcmask 523264   ;;  %s1182_s0 = inlined_call_operand.vmem [shape: f32[8,32], index: 0, kind: input, shape index: {}]   ;;  %s1183_s1 = inlined_call_operand.vmem [shape: f32[64,64], index: 1, kind: input, shape index: {}]   ;;  %s1184_s2 = inlined_call_operand.vmem [shape: f32[96,32], index: 2, kind: input, shape index: {}]   ;;  %s1185_s3 = inlined_call_operand.vmem [shape: f32[2,32], index: 3, kind: input, shape index: {}]   ;;  %s1186_s4 = inlined_call_operand.hbm [shape: f32[8,8], index: 4, kind: output, shape index: {}]  }
   0x1   :  { %v27_v0 = vld [vmem:[%s1184_s2] sm:$0xff]  ;;  %v28_v1 = vld [vmem:[%s1184_s2 + $0x8] sm:$0xff]  ;;  %804 = vmatprep.subr.bf16.mxu0 %v914_v3  ;;  %v29_v6 = vld [vmem:[%s1184_s2 + $0x10] sm:$0xff]  ;;  %773 = vmatprep.mubr.msk.f32.mxu0 %vm915_vm0, %v916_v8  ;;  %vm44_vm2 = vcmask 261120  }
   0x2   :  { %v31_v2 = vld [vmem:[%s1184_s2 + $0x20] sm:$0xff]  ;;  %v805_v4 = vpack.c.bf16 %v28_v1, %v27_v0  ;;  %v32_v5 = vld [vmem:[%s1184_s2 + $0x28] sm:$0xff]  ;;  %v30_v7 = vld [vmem:[%s1184_s2 + $0x18] sm:$0xff] }
   0x3   :  { %v810_v9 = vpack.c.bf16 %v32_v5, %v31_v2  ;;  %v33_v10 = vld [vmem:[%s1184_s2 + $0x30] sm:$0xff]  ;;  %v34_v11 = vld [vmem:[%s1184_s2 + $0x38] sm:$0xff]  ;;  %v808_v12 = vpack.c.bf16 %v30_v7, %v29_v6  ;;  %v35_v14 = vld [vmem:[%s1184_s2 + $0x40] sm:$0xff] }
   0x4   :  { %806 = vmatpush3.bf16.msra.mxu0 %v805_v4  ;;  %v814_v13 = vpack.c.bf16 %v34_v11, %v33_v10  ;;  %v36_v15 = vld [vmem:[%s1184_s2 + $0x48] sm:$0xff]  ;;  %v21_v16 = vld [vmem:[%s1183_s1 + $0x10] sm:$0xff]  ;;  %v18_v17 = vld [vmem:[%s1182_s0] sm:$0xff] }
   0x5   :  { %826 = vmatprep.subr.bf16.mxu1 %v810_v9  ;;  %807 = vmatprep.subr.bf16.mxu0 %v914_v3  ;;  %v818_v18 = vpack.c.bf16 %v36_v15, %v35_v14  ;;  %v37_v19 = vld [vmem:[%s1184_s2 + $0x50] sm:$0xff]  ;;  %v38_v20 = vld [vmem:[%s1184_s2 + $0x58] sm:$0xff] }
   0x6   :  { %830 = vmatpush3.bf16.msra.mxu1 %v810_v9  ;;  %795 = vmatprep.mubr.msk.f32.mxu1 %vm118_vm1, %v21_v16 }
   0x7   :  { %827 = vmatprep.subr.bf16.mxu1 %v814_v13 }
   0x8   :  { %809 = vmatpush3.bf16.msra.mxu0 %v808_v12 }
   0x9   :  { %9 = vsyncpa [#allocation3], 0  ;;  %811 = vmatprep.subr.bf16.mxu0 %v810_v9  ;;  %v19_v21 = vld [vmem:[%s1183_s1] sm:$0xff]  ;;  %v822_v22 = vpack.c.bf16 %v38_v20, %v37_v19  ;;  %v22_v23 = vld [vmem:[%s1183_s1 + $0x18] sm:$0xff]  ;;  %v40_v29 = vlaneseq  ;;  %v917_v31 = vmov 1966171168  }
   0xa   :  { %831 = vmatpush3.bf16.msra.mxu1 %v814_v13  ;;  %v23_v24 = vld [vmem:[%s1183_s1 + $0x20] sm:$0xff]  ;;  %v24_v25 = vld [vmem:[%s1183_s1 + $0x28] sm:$0xff]  ;;  %v25_v26 = vld [vmem:[%s1183_s1 + $0x30] sm:$0xff]  ;;  %v251_v32 = vunpack.c.l.s4 %v917_v31  ;;  %vm432_vm3 = vcmask 1041409   ;;  %vm434_vm4 = vcmask 1042434   ;;  %vm436_vm5 = vcmask 1043459  }
   0xb   :  { %774 = vmatmul.mubr.msk.f32.vlgmr.msra.gmra.mrb[0].mxu0 %vm44_vm2, %v18_v17  ;;  %828 = vmatprep.subr.bf16.mxu1 %v818_v18  ;;  %v20_v27 = vld [vmem:[%s1183_s1 + $0x8] sm:$0xff]  ;;  %v26_v28 = vld [vmem:[%s1183_s1 + $0x38] sm:$0xff]  ;;  %v1018_v30 = vshrl.u32 %v40_v29, 7  ;;  %v39_v34 = vld [vmem:[%s1185_s3] sm:$0x3]  ;;  %vm438_vm6 = vcmask 1044484  }
   0xc   :  { %813 = vmatpush3.bf16.msra.mxu0 %v810_v9  ;;  %792 = vmatprep.mubr.msk.f32.mxu0 %vm118_vm1, %v19_v21  ;;  %v252_v35 = vunpack.c.0.s8 %v251_v32  ;;  %vm440_vm7 = vcmask 1045509   ;;  %vm442_vm8 = vcmask 1046534   ;;  %vm444_vm9 = vcmask 1047559   ;;  %s919_s1 = smov [#allocation2]  }
   0xd   :  { %815 = vmatprep.subr.bf16.mxu0 %v814_v13  ;;  %v1021_v33 = vsub.s32 0, %v1018_v30  ;;  %v1035_v5 = vsub.s32 1, %v1018_v30  ;;  %vm447_vm10 = vcmask 64512   ;;  %s727_s3 = sshll.u32 %s919_s1, 4  ;;  %s728_s3 = int_to_ptr.vmem [resolvable:$true] %s727_s3 }
   0xe   :  { %832 = vmatpush3.bf16.msra.mxu1 %v818_v18  ;;  %v255_v37 = vsub.s32 %v252_v35, %v1018_v30  ;;  %s890_s5 = scalar_lea.vmem %s728_s3, 128  ;;  %p895_p1 = scmp.lt.s32.totalorder %s728_s3, %s728_s3 }
   0xf   :  { %829 = vmatprep.subr.bf16.mxu1 %v822_v22  ;;  %v43_v36 = vrot.slane %v39_v34, %v1021_v33  ;;  %v357_v15 = vrot.slane %v39_v34, %v1035_v5  ;;  %p891_p0 = scmp.ne.s32.totalorder %s728_s3, %s890_s5  ;;  %p896_p2 = scmp.lt.s32.totalorder %s890_s5, %s890_s5 }
  0x10   :  { %817 = vmatpush3.bf16.msra.mxu0 %v814_v13 }
  0x11   :  { %819 = vmatprep.subr.bf16.mxu0 %v818_v18  ;;  %p897_p3 = por %p896_p2, %p895_p1 }
  0x12   :  { %833 = vmatpush3.bf16.msra.mxu1 %v822_v22 }
  0x13   :  { %p898_p4 = pnand %p897_p3, %p891_p0 }
  0x14   :  { %821 = vmatpush3.bf16.msra.mxu0 %v818_v18 }
  0x15   :  { %796 = vmatmul.mubr.msk.f32.vlgmr.msra.gmra.mrb[0].mxu1 %vm118_vm1, %v22_v23  ;;  %823 = vmatprep.subr.bf16.mxu0 %v822_v22 }
  0x16   :  { %798 = vmatprep.mubr.msk.f32.mxu1 %vm118_vm1, %v23_v24 }
  0x18   :  { %825 = vmatpush3.bf16.msra.mxu0 %v822_v22 }
  0x19   :  { %799 = vmatmul.mubr.msk.f32.gmra.mrb[2].mxu1 %vm118_vm1, %v24_v25 }
  0x1a   :  { %801 = vmatprep.mubr.msk.f32.mxu1 %vm118_vm1, %v25_v26 }
  0x1b   :  { %793 = vmatmul.mubr.msk.f32.vlgmr.msra.gmra.mrb[2].mxu0 %vm118_vm1, %v20_v27 }
  0x1d   :  { %802 = vmatmul.mubr.msk.f32.gmra.mrb[4].mxu1 %vm118_vm1, %v26_v28 }
  0xde   :  { %v114_v38 = vpop.f32.mrb[0].mxu0 }
  0xdf   :  { %v115_v39 = vadd.f32 %v114_v38, %v43_v36  ;;  %v775_v40 = vpop.f32.mrb[1].mxu0 }
  0xe1   :  { %v249_v41 = vcombine.high %v115_v39, %v115_v39  ;;  %v256_v42 = vrot.slane %v115_v39, %v255_v37 }
  0xe3   :  { %v263_v43 = vrot.slane %v249_v41, %v255_v37  ;;  %v264_v44 = vcombine.high %v256_v42, %v256_v42  ;;  %v272_v45 = vrot.slane %v256_v42, %v255_v37 }
  0xe5   :  { %v286_v46 = vrot.slane %v264_v44, %v255_v37  ;;  %v294_v47 = vcombine.high %v272_v45, %v272_v45  ;;  %v265_v48 = vcombine.high %v263_v43, %v263_v43  ;;  %v279_v53 = vrot.slane %v263_v43, %v255_v37 }
  0xe6   :  { %v301_v4 = vrot.slane %v272_v45, %v1021_v33  ;;  %v399_v44 = vand.u32 127, %v40_v29 }
  0xe7   :  { %v296_v49 = vcombine.high %v286_v46, %v286_v46  ;;  %v309_v50 = vrot.slane %v294_v47, %v1021_v33  ;;  %v293_v51 = vrot.slane %v265_v48, %v255_v37  ;;  %v317_v61 = vrot.slane %v279_v53, %v1021_v33 }
  0xe8   :  { %v797_v52 = vpop.f32.mrb[0].mxu1  ;;  %v295_v62 = vcombine.high %v279_v53, %v279_v53  ;;  %v305_v1 = vrot.slane %v286_v46, %v1021_v33  ;;  %v1050_v47 = vsub.s32 %v399_v44, %v1018_v30 }
  0xe9   :  { %v313_v54 = vrot.slane %v296_v49, %v1021_v33  ;;  %v219_v55 = vpop.f32.mrb[1].mxu1  ;;  %v321_v56 = vrot.slane %v293_v51, %v1021_v33  ;;  %v297_v59 = vcombine.high %v293_v51, %v293_v51 }
  0xea   :  { %v340_v57 = vadd.f32 %v309_v50, %v219_v55  ;;  %v325_v11 = vrot.slane %v295_v62, %v1021_v33 }
  0xeb   :  { %v341_v58 = vadd.f32 %v797_v52, %v313_v54  ;;  %v329_v8 = vrot.slane %v297_v59, %v1021_v33 }
  0xec   :  { %842 = vtanh.f32 %v340_v57  ;;  %v800_v60 = vpop.f32.mrb[2].mxu1 }
  0xed   :  { %844 = vtanh.f32 %v341_v58  ;;  %v343_v63 = vadd.f32 %v800_v60, %v321_v56  ;;  %v229_v0 = vpop.f32.mrb[3].mxu1 }
  0xee   :  { %v342_v2 = vadd.f32 %v317_v61, %v229_v0  ;;  %v794_v3 = vpop.f32.mrb[2].mxu0 }
  0xef   :  { %v339_v6 = vadd.f32 %v794_v3, %v305_v1  ;;  %v209_v7 = vpop.f32.mrb[3].mxu0  ;;  %846 = vtanh.f32 %v343_v63 }
  0xf0   :  { %v338_v9 = vadd.f32 %v301_v4, %v209_v7  ;;  %v803_v10 = vpop.f32.mrb[4].mxu1  ;;  %v918_v4 = vmov 0   ;;  %v466_v7 = vsub.s32 3, %v1018_v30 }
  0xf1   :  { %848 = vtanh.f32 %v339_v6  ;;  %v345_v12 = vadd.f32 %v803_v10, %v329_v8  ;;  %v239_v13 = vpop.f32.mrb[5].mxu1  ;;  %841 = vset.pattern.permute.xlu0 %v918_v4  ;;  %840 = vset.pattern.permute.xlu1 %v918_v4  ;;  %v462_v6 = vsub.s32 2, %v1018_v30 }
  0xf2   :  { %850 = vtanh.f32 %v338_v9  ;;  %v344_v14 = vadd.f32 %v325_v11, %v239_v13 }
  0xf3   :  { %852 = vtanh.f32 %v345_v12  ;;  %v470_v12 = vsub.s32 4, %v1018_v30 }
  0xf4   :  { %854 = vtanh.f32 %v342_v2 }
  0xf5   :  { %856 = vtanh.f32 %v344_v14 }
  0xf6   :  { %v843_v16 = vpop.eup %842 }
  0xf7   :  { %v845_v17 = vpop.eup %844  ;;  %v360_v18 = vmul.f32 %v843_v16, %v357_v15 }
  0xf8   :  { %v361_v19 = vmul.f32 %v845_v17, %v357_v15 }
  0xf9   :  { %v372_v20 = vsel %vm44_vm2, %v360_v18, 0.0  ;;  %v847_v21 = vpop.eup %846 }
  0xfa   :  { %373 = vadd.xlane.f32.xlu1 %v372_v20  ;;  %v375_v23 = vsel %vm44_vm2, %v361_v19, 0.0  ;;  %v363_v26 = vmul.f32 %v847_v21, %v357_v15  ;;  %v474_v19 = vsub.s32 5, %v1018_v30 }
  0xfb   :  { %v849_v22 = vpop.eup %848 }
  0xfc   :  { %v851_v24 = vpop.eup %850  ;;  %v359_v25 = vmul.f32 %v849_v22, %v357_v15  ;;  %v381_v34 = vsel %vm44_vm2, %v363_v26, 0.0 }
  0xfd   :  { %v853_v27 = vpop.eup %852  ;;  %v358_v31 = vmul.f32 %v851_v24, %v357_v15 }
  0xfe   :  { %376 = vadd.xlane.f32.xlu1 %v375_v23  ;;  %v369_v28 = vsel %vm44_vm2, %v359_v25, 0.0  ;;  %v855_v32 = vpop.eup %854  ;;  %v365_v35 = vmul.f32 %v853_v27, %v357_v15  ;;  %v478_v23 = vsub.s32 6, %v1018_v30  ;;  %v482_v27 = vsub.s32 7, %v1018_v30 }
  0xff   :  { %370 = vadd.xlane.f32.xlu0 %v369_v28  ;;  %v366_v36 = vsel %vm44_vm2, %v358_v31, 0.0  ;;  %v362_v37 = vmul.f32 %v855_v32, %v357_v15  ;;  %v857_v38 = vpop.eup %856 }
 0x100   :  { %v387_v39 = vsel %vm44_vm2, %v365_v35, 0.0  ;;  %v364_v41 = vmul.f32 %v857_v38, %v357_v15 }
 0x101   :  { %v378_v40 = vsel %vm44_vm2, %v362_v37, 0.0 }
 0x102   :  { %382 = vadd.xlane.f32.xlu1 %v381_v34  ;;  %v384_v42 = vsel %vm44_vm2, %v364_v41, 0.0 }
 0x103   :  { %367 = vadd.xlane.f32.xlu0 %v366_v36 }
 0x106   :  { %388 = vadd.xlane.f32.xlu1 %v387_v39 }
 0x107   :  { %379 = vadd.xlane.f32.xlu0 %v378_v40 }
 0x10b   :  { %385 = vadd.xlane.f32.xlu0 %v384_v42 }
 0x187   :  { %v374_v43 = vpop.xlane.xlu1 %373 }
 0x188   :  { %v411_v52 = vrot.slane %v374_v43, %v1050_v47 }
 0x18b   :  { %v377_v45 = vpop.xlane.xlu1 %376 }
 0x18c   :  { %v371_v46 = vpop.xlane.xlu0 %370  ;;  %v415_v53 = vrot.slane %v377_v45, %v1050_v47 }
 0x18d   :  { %v407_v49 = vrot.slane %v371_v46, %v1050_v47 }
 0x18f   :  { %v1053_v50 = vpop.xlane.xlu1 %382 }
 0x190   :  { %v368_v48 = vpop.xlane.xlu0 %367  ;;  %v423_v60 = vrot.slane %v1053_v50, %v1050_v47 }
 0x191   :  { %v403_v51 = vrot.slane %v368_v48, %v1050_v47 }
 0x193   :  { %v433_v29 = vsel %vm432_vm3, %v407_v49, %v403_v51  ;;  %v1062_v58 = vpop.xlane.xlu1 %388 }
 0x194   :  { %v435_v54 = vsel %vm434_vm4, %v411_v52, %v433_v29  ;;  %v380_v55 = vpop.xlane.xlu0 %379  ;;  %v431_v63 = vrot.slane %v1062_v58, %v1050_v47 }
 0x195   :  { %v437_v56 = vsel %vm436_vm5, %v415_v53, %v435_v54  ;;  %v419_v57 = vrot.slane %v380_v55, %v1050_v47 }
 0x197   :  { %v439_v59 = vsel %vm438_vm6, %v419_v57, %v437_v56 }
 0x198   :  { %v386_v61 = vpop.xlane.xlu0 %385  ;;  %v441_v0 = vsel %vm440_vm7, %v423_v60, %v439_v59 }
 0x199   :  { %v427_v62 = vrot.slane %v386_v61, %v1050_v47 }
 0x19b   :  { %v443_v1 = vsel %vm442_vm8, %v427_v62, %v441_v0 }
 0x19c   :  { %v445_v2 = vsel %vm444_vm9, %v431_v63, %v443_v1 }
 0x19d   :  { %v448_v3 = vsel %vm447_vm10, %v445_v2, -inf }
 0x19e   :  { %449 = vmax.xlane.f32.xlu0 %v448_v3 }
 0x22b   :  { %v450_v8 = vpop.xlane.xlu0 %449 }
 0x22c   :  { %v455_v9 = vrot.slane %v450_v8, %v1021_v33  ;;  %v459_v10 = vrot.slane %v450_v8, %v1035_v5  ;;  %v463_v11 = vrot.slane %v450_v8, %v462_v6  ;;  %v467_v13 = vrot.slane %v450_v8, %v466_v7 }
 0x22d   :  { %v471_v20 = vrot.slane %v450_v8, %v470_v12  ;;  %v475_v24 = vrot.slane %v450_v8, %v474_v19  ;;  %v479_v28 = vrot.slane %v450_v8, %v478_v23  ;;  %v483_v36 = vrot.slane %v450_v8, %v482_v27 }
 0x22e   :  { %v492_v14 = vsub.f32 %v368_v48, %v455_v9  ;;  %v493_v15 = vsub.f32 %v371_v46, %v459_v10  ;;  %v494_v16 = vsub.f32 %v374_v43, %v463_v11  ;;  %v495_v21 = vsub.f32 %v377_v45, %v467_v13 }
 0x22f   :  { %v496_v25 = vsub.f32 %v380_v55, %v471_v20  ;;  %v497_v31 = vsub.f32 %v1053_v50, %v475_v24  ;;  %v498_v37 = vsub.f32 %v386_v61, %v479_v28  ;;  %v499_v40 = vsub.f32 %v1062_v58, %v483_v36 }
 0x230   :  { %v500_v17 = vmul.f32 1.442695, %v492_v14  ;;  %v502_v18 = vmul.f32 1.442695, %v493_v15  ;;  %v504_v22 = vmul.f32 1.442695, %v494_v16 }
 0x231   :  { %v506_v26 = vmul.f32 1.442695, %v495_v21  ;;  %v508_v32 = vmul.f32 1.442695, %v496_v25  ;;  %v510_v38 = vmul.f32 1.442695, %v497_v31 }
 0x232   :  { %858 = vpow2.f32 %v500_v17  ;;  %v512_v41 = vmul.f32 1.442695, %v498_v37  ;;  %v514_v43 = vmul.f32 1.442695, %v499_v40 }
 0x233   :  { %860 = vpow2.f32 %v502_v18 }
 0x234   :  { %862 = vpow2.f32 %v504_v22 }
 0x235   :  { %864 = vpow2.f32 %v506_v26 }
 0x236   :  { %866 = vpow2.f32 %v508_v32 }
 0x237   :  { %868 = vpow2.f32 %v510_v38 }
 0x238   :  { %870 = vpow2.f32 %v512_v41 }
 0x239   :  { %872 = vpow2.f32 %v514_v43 }
 0x23c   :  { %v859_v34 = vpop.eup %858 }
 0x23d   :  { %v1093_v35 = vpop.eup %860  ;;  %525 = vperm.xlu1 %840, %v859_v34  }
 0x23e   :  { %528 = vperm.xlu0 %841, %v1093_v35   ;;  %v1098_v39 = vpop.eup %862 }
 0x23f   :  { %v1102_v42 = vpop.eup %864 }
 0x240   :  { %v1105_v44 = vpop.eup %866 }
 0x241   :  { %531 = vperm.xlu1 %840, %v1098_v39   ;;  %v1108_v45 = vpop.eup %868 }
 0x242   :  { %v1111_v46 = vpop.eup %870 }
 0x243   :  { %v1114_v48 = vpop.eup %872 }
 0x245   :  { %534 = vperm.xlu1 %840, %v1102_v42  }
 0x249   :  { %537 = vperm.xlu1 %840, %v1105_v44  }
 0x24d   :  { %540 = vperm.xlu1 %840, %v1108_v45  }
 0x251   :  { %543 = vperm.xlu1 %840, %v1111_v46  }
 0x255   :  { %546 = vperm.xlu1 %840, %v1114_v48  }
 0x2bc   :  { %v526_v49 = vpop.permute.xlu1 %525 }
 0x2bd   :  { %v529_v53 = vpop.permute.xlu0 %528  ;;  %v551_v55 = vrot.slane %v526_v49, %v1050_v47 }
 0x2be   :  { %v555_v54 = vrot.slane %v529_v53, %v1050_v47 }
 0x2c0   :  { %v532_v50 = vpop.permute.xlu1 %531  ;;  %v580_v60 = vsel %vm432_vm3, %v555_v54, %v551_v55 }
 0x2c1   :  { %v559_v56 = vrot.slane %v532_v50, %v1050_v47 }
 0x2c3   :  { %v581_v62 = vsel %vm434_vm4, %v559_v56, %v580_v60 }
 0x2c4   :  { %v535_v51 = vpop.permute.xlu1 %534 }
 0x2c5   :  { %v563_v57 = vrot.slane %v535_v51, %v1050_v47 }
 0x2c7   :  { %v582_v0 = vsel %vm436_vm5, %v563_v57, %v581_v62 }
 0x2c8   :  { %v538_v52 = vpop.permute.xlu1 %537 }
 0x2c9   :  { %v567_v58 = vrot.slane %v538_v52, %v1050_v47 }
 0x2cb   :  { %v583_v1 = vsel %vm438_vm6, %v567_v58, %v582_v0 }
 0x2cc   :  { %v541_v29 = vpop.permute.xlu1 %540 }
 0x2cd   :  { %v571_v61 = vrot.slane %v541_v29, %v1050_v47 }
 0x2cf   :  { %v584_v3 = vsel %vm440_vm7, %v571_v61, %v583_v1 }
 0x2d0   :  { %v544_v59 = vpop.permute.xlu1 %543 }
 0x2d1   :  { %v575_v63 = vrot.slane %v544_v59, %v1050_v47 }
 0x2d3   :  { %v585_v8 = vsel %vm442_vm8, %v575_v63, %v584_v3 }
 0x2d4   :  { %v547_v2 = vpop.permute.xlu1 %546 }
 0x2d5   :  { %v579_v4 = vrot.slane %v547_v2, %v1050_v47 }
 0x2d7   :  { %v586_v9 = vsel %vm444_vm9, %v579_v4, %v585_v8 }
 0x2d8   :  { %v588_v10 = vsel %vm447_vm10, %v586_v9, 0.0 }
 0x2d9   :  { %589 = vadd.xlane.f32.xlu1 %v588_v10 }
 0x366   :  { %v590_v11 = vpop.xlane.xlu1 %589 }
 0x367   :  { %v595_v13 = vrot.slane %v590_v11, %v1021_v33  ;;  %v599_v14 = vrot.slane %v590_v11, %v1035_v5  ;;  %v603_v15 = vrot.slane %v590_v11, %v462_v6  ;;  %v607_v16 = vrot.slane %v590_v11, %v466_v7 }
 0x368   :  { %v611_v18 = vrot.slane %v590_v11, %v470_v12  ;;  %v615_v33 = vrot.slane %v590_v11, %v474_v19  ;;  %v619_v6 = vrot.slane %v590_v11, %v478_v23  ;;  %v623_v12 = vrot.slane %v590_v11, %v482_v27 }
 0x369   :  { %874 = vrcp.f32 %v595_v13 }
 0x36a   :  { %876 = vrcp.f32 %v599_v14 }
 0x36b   :  { %878 = vrcp.f32 %v603_v15 }
 0x36c   :  { %880 = vrcp.f32 %v607_v16 }
 0x36d   :  { %882 = vrcp.f32 %v611_v18 }
 0x36e   :  { %884 = vrcp.f32 %v615_v33 }
 0x36f   :  { %886 = vrcp.f32 %v619_v6 }
 0x370   :  { %888 = vrcp.f32 %v623_v12 }
 0x373   :  { %v875_v17 = vpop.eup %874 }
 0x374   :  { %v633_v20 = vmul.f32 %v875_v17, %v859_v34  ;;  %v877_v21 = vpop.eup %876 }
 0x375   :  { %v635_v5 = vmul.f32 %v877_v21, %v1093_v35  ;;  %v879_v22 = vpop.eup %878 }
 0x376   :  { %657 = vperm.xlu0 %841, %v633_v20   ;;  %v637_v7 = vmul.f32 %v879_v22, %v1098_v39  ;;  %v881_v24 = vpop.eup %880 }
 0x377   :  { %v639_v25 = vmul.f32 %v881_v24, %v1102_v42  ;;  %v883_v26 = vpop.eup %882 }
 0x378   :  { %v641_v19 = vmul.f32 %v883_v26, %v1105_v44  ;;  %v885_v28 = vpop.eup %884 }
 0x379   :  { %v643_v31 = vmul.f32 %v885_v28, %v1108_v45  ;;  %v887_v23 = vpop.eup %886 }
 0x37a   :  { %660 = vperm.xlu0 %841, %v635_v5   ;;  %v645_v32 = vmul.f32 %v887_v23, %v1111_v46  ;;  %v889_v34 = vpop.eup %888 }
 0x37b   :  { %v647_v30 = vmul.f32 %v889_v34, %v1114_v48 }
 0x37e   :  { %663 = vperm.xlu0 %841, %v637_v7  }
 0x382   :  { %666 = vperm.xlu0 %841, %v639_v25  }
 0x386   :  { %669 = vperm.xlu0 %841, %v641_v19  }
 0x38a   :  { %672 = vperm.xlu0 %841, %v643_v31  }
 0x38e   :  { %675 = vperm.xlu0 %841, %v645_v32  }
 0x392   :  { %678 = vperm.xlu0 %841, %v647_v30  }
 0x3f5   :  { %v658_v27 = vpop.permute.xlu0 %657 }
 0x3f6   :  { %v683_v42 = vrot.slane %v658_v27, %v1050_v47 }
 0x3f9   :  { %v661_v35 = vpop.permute.xlu0 %660 }
 0x3fa   :  { %v687_v40 = vrot.slane %v661_v35, %v1050_v47 }
 0x3fc   :  { %v712_v46 = vsel %vm432_vm3, %v687_v40, %v683_v42 }
 0x3fd   :  { %v664_v36 = vpop.permute.xlu0 %663 }
 0x3fe   :  { %v691_v41 = vrot.slane %v664_v36, %v1050_v47 }
 0x400   :  { %v713_v49 = vsel %vm434_vm4, %v691_v41, %v712_v46 }
 0x401   :  { %v667_v37 = vpop.permute.xlu0 %666 }
 0x402   :  { %v695_v43 = vrot.slane %v667_v37, %v1050_v47 }
 0x404   :  { %v714_v51 = vsel %vm436_vm5, %v695_v43, %v713_v49 }
 0x405   :  { %v670_v38 = vpop.permute.xlu0 %669 }
 0x406   :  { %v699_v44 = vrot.slane %v670_v38, %v1050_v47 }
 0x408   :  { %v715_v52 = vsel %vm438_vm6, %v699_v44, %v714_v51 }
 0x409   :  { %v673_v39 = vpop.permute.xlu0 %672 }
 0x40a   :  { %v703_v48 = vrot.slane %v673_v39, %v1050_v47 }
 0x40c   :  { %v716_v29 = vsel %vm440_vm7, %v703_v48, %v715_v52 }
 0x40d   :  { %v676_v45 = vpop.permute.xlu0 %675 }
 0x40e   :  { %v707_v50 = vrot.slane %v676_v45, %v1050_v47 }
 0x410   :  { %v717_v55 = vsel %vm442_vm8, %v707_v50, %v716_v29 }
 0x411   :  { %v679_v53 = vpop.permute.xlu0 %678 }
 0x412   :  { %v711_v54 = vrot.slane %v679_v53, %v1050_v47 }
 0x414   :  { %v718_v56 = vsel %vm444_vm9, %v711_v54, %v717_v55 }
 0x415   :  { %720 = vst.msk [vmem:[#allocation2] sm:$0xff] %vm447_vm10, %v718_v56 }
 0x416   :  { %901 = shalt.err (!%p898_p4)
}
 0x417   :  { %s902_s8 = scalar_lea.hbm %s1186_s4, 128 }
 0x418   :  { %p903_p5 = scmp.ne.s32.totalorder %s1186_s4, %s902_s8  ;;  %p906_p6 = scmp.lt.u32.totalorder %s902_s8, %s1186_s4 }
 0x41a   :  { %p908_p7 = pnand %p906_p6, %p903_p5 }
 0x41c   :  { %911 = shalt.err (!%p908_p7)
}
 0x41d   :  { %730 = dma.vmem_to_hbm [thread:$0]  %s728_s3, 128, %s1186_s4, [#allocation3]  }
 0x41e   :  { %912 = dma.done.wait [#allocation3], 128  }
 0x41f   :  { %913 = vsyncadd [#allocation3], 4294967168 }
 0x420   :  { %734 = vsyncpa [#allocation3], 1 }

</bundles_post_ra>
